<compile_context>
chip_gen: v6e
topology: v6e:2x2x1
jax: 0.10.0
libtpu: 0.0.40
codegen_flags: <defaults>
</compile_context>

<pallas_src>
import functools

import jax
import jax.numpy as jnp
from jax.experimental import pallas as pl
from jax.experimental.pallas import tpu as pltpu

_MAX_TB = 128 * 1024  # lane cap per tile (~16 MiB of double-buffered VMEM traffic)


def _mlp_kernel(x_ref, w1_ref, b1_ref, w2_ref, b2_ref, o_ref):
    # x_ref: (6, TB) [bf16 or f32]   w1_ref: (64, 6) [bf16 or f32]
    # b1_ref: (64, 1) f32            w2_ref: (1, 64) f32
    # b2_ref: (1, 1) f32 in SMEM     o_ref:  (1, TB) f32 (lane-dense)
    h = jnp.dot(w1_ref[...], x_ref[...], preferred_element_type=jnp.float32)  # (64, TB)
    h = jnp.maximum(h + b1_ref[...], 0.0)                                     # bias + ReLU
    y = jnp.dot(w2_ref[...], h, preferred_element_type=jnp.float32)           # (1, TB)
    o_ref[...] = jax.nn.sigmoid(y + b2_ref[0, 0])                             # scalar bias


@functools.partial(jax.jit, static_argnames=("block_b", "compute_dtype"))
def mlp_forward(x, w1, b1, w2, b2, *, block_b=64 * 1024, compute_dtype=jnp.bfloat16):
    """sigmoid(relu(x @ w1.T + b1) @ w2.T + b2) for x:(B,6); returns (B,1) f32."""
    B = x.shape[0]
    H, F = w1.shape                               # (64, 6)
    b_pad = 128 * pl.cdiv(B, 128)                 # minimal lane-aligned pad (< 128 extra)

    # --- batch tile selection ------------------------------------------------
    # Multiple of 128 (lane rule), MiB-scale by default, capped so large batches
    # keep >= 4 grid steps (>= 2 per TC on v7x megacore) without shrinking steps
    # below a reasonable size.
    tb = min(block_b, _MAX_TB, b_pad)
    quarter = (b_pad // 4) // 128 * 128
    if quarter >= 1024:
        tb = min(tb, quarter)
    tb = 128 * pl.cdiv(max(tb, 1), 128)           # never trust caller's alignment
    grid = pl.cdiv(b_pad, tb)

    # --- host-side prep (single fused cast/transpose/pad pass) ---------------
    cdtype = jnp.dtype(compute_dtype)
    x_t = x.astype(cdtype).T                      # (6, B): batch on lanes
    if b_pad != B:
        x_t = jnp.pad(x_t, ((0, 0), (0, b_pad - B)))
    w1_c = w1.astype(cdtype)
    b1_col = b1.reshape(-1, 1).astype(jnp.float32)
    w2_r = w2.reshape(1, -1).astype(jnp.float32)
    b2_s = b2.reshape(1, 1).astype(jnp.float32)

    flops = 2 * b_pad * (F * H + H * 1)
    bytes_accessed = (b_pad * F * cdtype.itemsize + b_pad * 4
                      + H * F * cdtype.itemsize + (H + H + 1) * 4)

    out_t = pl.pallas_call(
        _mlp_kernel,
        out_shape=jax.ShapeDtypeStruct((1, b_pad), jnp.float32),
        grid=(grid,),
        in_specs=[
            pl.BlockSpec((F, tb), lambda i: (0, i)),             # x tile (batch on lanes)
            pl.BlockSpec((H, F), lambda i: (0, 0)),              # w1: resident
            pl.BlockSpec((H, 1), lambda i: (0, 0)),              # b1: resident
            pl.BlockSpec((1, H), lambda i: (0, 0)),              # w2: resident
            pl.BlockSpec(memory_space=pltpu.MemorySpace.SMEM),   # b2: scalar in SMEM
        ],
        out_specs=pl.BlockSpec((1, tb), lambda i: (0, i)),       # lane-dense, unmasked vst
        compiler_params=pltpu.CompilerParams(
            dimension_semantics=("parallel",),        # shard batch tiles across TCs (v7x)
            vmem_limit_bytes=48 * 1024 * 1024,        # <= v7x 64 MiB; tiles use ~8-17 MiB
            allow_input_fusion=[True, False, False, False, False],
        ),
        cost_estimate=pl.CostEstimate(
            flops=flops, transcendentals=b_pad, bytes_accessed=bytes_accessed),
    )(x_t, w1_c, b1_col, w2_r, b2_s)

    # Drop padded columns, restore (B, 1) outside the kernel.
    return out_t[0, :B].reshape(B, 1)


def init_params(key):
    """Mirror nn.Linear default init (uniform +/- 1/sqrt(fan_in))."""
    k1, k2, k3, k4 = jax.random.split(key, 4)
    bound1 = 1.0 / jnp.sqrt(6.0)
    bound2 = 1.0 / jnp.sqrt(64.0)
    w1 = jax.random.uniform(k1, (64, 6), jnp.float32, -bound1, bound1)   # (out, in)
    b1 = jax.random.uniform(k2, (64,), jnp.float32, -bound1, bound1)
    w2 = jax.random.uniform(k3, (1, 64), jnp.float32, -bound2, bound2)
    b2 = jax.random.uniform(k4, (1,), jnp.float32, -bound2, bound2)
    return w1, b1, w2, b2


def reference_forward(x, w1, b1, w2, b2):
    h = jnp.maximum(x @ w1.T + b1, 0.0)
    return jax.nn.sigmoid(h @ w2.T + b2)


if __name__ == "__main__":
    key = jax.random.PRNGKey(0)
    kx, kp = jax.random.split(key)
    w1, b1, w2, b2 = init_params(kp)

    # 1) Small batch, f32 path: single 128-lane tile, grid=(1,).
    B = 8
    x = jax.random.normal(kx, (B, 6), jnp.float32)
    out = jax.block_until_ready(mlp_forward(x, w1, b1, w2, b2, compute_dtype=jnp.float32))
    ref = reference_forward(x, w1, b1, w2, b2)
    assert out.shape == (B, 1)
    assert jnp.allclose(out, ref, atol=5e-3, rtol=5e-3), float(jnp.max(jnp.abs(out - ref)))

    # 2) Padded batch (300 -> 384 lanes), default bf16 x/w1 stream, f32 accumulate.
    B2 = 300
    x2 = jax.random.normal(kx, (B2, 6), jnp.float32)
    out2 = jax.block_until_ready(mlp_forward(x2, w1, b1, w2, b2))
    ref2 = reference_forward(x2, w1, b1, w2, b2)
    assert out2.shape == (B2, 1)
    assert jnp.allclose(out2, ref2, atol=2e-2, rtol=2e-2), float(jnp.max(jnp.abs(out2 - ref2)))

    # 3) Multi-step pipelined grid at toy scale (block_b=512 -> 5 tiles incl. a
    #    ragged last block); per-column math makes the boundary handling exact.
    B3 = 2100
    x3 = jax.random.normal(kx, (B3, 6), jnp.float32)
    out3 = jax.block_until_ready(mlp_forward(x3, w1, b1, w2, b2, block_b=512))
    ref3 = reference_forward(x3, w1, b1, w2, b2)
    assert out3.shape == (B3, 1)
    assert jnp.allclose(out3, ref3, atol=2e-2, rtol=2e-2), float(jnp.max(jnp.abs(out3 - ref3)))

    print("KERNEL_OK")
</pallas_src>

<mosaic_0001>
module attributes {stable_mosaic.version = 11 : i64} {
  func.func @_mlp_kernel(%arg0: i32, %arg1: memref<6x128xf32, #tpu.memory_space<vmem>>, %arg2: memref<64x6xf32, #tpu.memory_space<vmem>>, %arg3: memref<64x1xf32, #tpu.memory_space<vmem>>, %arg4: memref<1x64xf32, #tpu.memory_space<vmem>>, %arg5: memref<1x1xf32, #tpu.memory_space<smem>>, %arg6: memref<1x128xf32, #tpu.memory_space<vmem>>) attributes {dimension_semantics = [#tpu.dimension_semantics<parallel>], iteration_bounds = array<i64: 1>, scalar_prefetch = 0 : i64, scratch_operands = 0 : i64, tpu.core_type = #tpu.core_type<tc>, window_params = [{transform_indices = @transform_0, window_bounds = array<i64: 6, 128>}, {pipeline_mode = #tpu.pipeline_mode<synchronous>, transform_indices = @transform_1, window_bounds = array<i64: 64, 6>}, {pipeline_mode = #tpu.pipeline_mode<synchronous>, transform_indices = @transform_2, window_bounds = array<i64: 64, 1>}, {pipeline_mode = #tpu.pipeline_mode<synchronous>, transform_indices = @transform_3, window_bounds = array<i64: 1, 64>}, {transform_indices = @transform_4, window_bounds = array<i64: 1, 1>}, {transform_indices = @transform_5, window_bounds = array<i64: 1, 128>}]} {
    %c0 = arith.constant 0 : index
    %c0_0 = arith.constant 0 : index
    %0 = vector.load %arg2[%c0, %c0_0] : memref<64x6xf32, #tpu.memory_space<vmem>>, vector<64x6xf32>
    %c0_1 = arith.constant 0 : index
    %c0_2 = arith.constant 0 : index
    %1 = vector.load %arg1[%c0_1, %c0_2] : memref<6x128xf32, #tpu.memory_space<vmem>>, vector<6x128xf32>
    %cst = arith.constant dense<0.000000e+00> : vector<64x128xf32>
    %2 = tpu.matmul %0, %1, %cst {dimension_numbers = #tpu.dot_dimension_numbers<[1], [0], [0], [1], [0, 0, 1, 1], [], []>} : vector<64x6xf32>, vector<6x128xf32>, vector<64x128xf32> -> vector<64x128xf32>
    %c0_3 = arith.constant 0 : index
    %c0_4 = arith.constant 0 : index
    %3 = vector.load %arg3[%c0_3, %c0_4] : memref<64x1xf32, #tpu.memory_space<vmem>>, vector<64x1xf32>
    %4 = vector.broadcast %3 : vector<64x1xf32> to vector<64x128xf32>
    %5 = arith.addf %2, %4 : vector<64x128xf32>
    %cst_5 = arith.constant 0.000000e+00 : f32
    %6 = vector.broadcast %cst_5 : f32 to vector<64x128xf32>
    %7 = arith.maximumf %5, %6 : vector<64x128xf32>
    %c0_6 = arith.constant 0 : index
    %c0_7 = arith.constant 0 : index
    %8 = vector.load %arg4[%c0_6, %c0_7] : memref<1x64xf32, #tpu.memory_space<vmem>>, vector<1x64xf32>
    %cst_8 = arith.constant dense<0.000000e+00> : vector<1x128xf32>
    %9 = tpu.matmul %8, %7, %cst_8 {dimension_numbers = #tpu.dot_dimension_numbers<[1], [0], [0], [1], [0, 0, 1, 1], [], []>} : vector<1x64xf32>, vector<64x128xf32>, vector<1x128xf32> -> vector<1x128xf32>
    %c0_9 = arith.constant 0 : index
    %c0_10 = arith.constant 0 : index
    %10 = memref.load %arg5[%c0_9, %c0_10] : memref<1x1xf32, #tpu.memory_space<smem>>
    %11 = vector.broadcast %10 : f32 to vector<1x128xf32>
    %12 = arith.addf %9, %11 : vector<1x128xf32>
    %13 = arith.negf %12 : vector<1x128xf32>
    %14 = math.exp %13 : vector<1x128xf32>
    %cst_11 = arith.constant 1.000000e+00 : f32
    %15 = vector.broadcast %cst_11 : f32 to vector<1x128xf32>
    %16 = arith.addf %15, %14 : vector<1x128xf32>
    %17 = arith.divf %15, %16 : vector<1x128xf32>
    %c0_12 = arith.constant 0 : index
    %c0_13 = arith.constant 0 : index
    %18 = vector.load %arg6[%c0_12, %c0_13] : memref<1x128xf32, #tpu.memory_space<vmem>>, vector<1x128xf32>
    tpu.vector_store %arg6[%c0_12, %c0_13], %17 {strides = array<i32>} : memref<1x128xf32, #tpu.memory_space<vmem>>, vector<1x128xf32>,
    return
  }
  func.func @transform_0(%arg0: i32) -> (i32, i32) {
    %c0_i32 = arith.constant 0 : i32
    %c0_i32_0 = arith.constant 0 : i32
    return %c0_i32, %arg0 : i32, i32
  }
  func.func @transform_1(%arg0: i32) -> (i32, i32) {
    %c0_i32 = arith.constant 0 : i32
    %c0_i32_0 = arith.constant 0 : i32
    %c0_i32_1 = arith.constant 0 : i32
    return %c0_i32, %c0_i32_0 : i32, i32
  }
  func.func @transform_2(%arg0: i32) -> (i32, i32) {
    %c0_i32 = arith.constant 0 : i32
    %c0_i32_0 = arith.constant 0 : i32
    %c0_i32_1 = arith.constant 0 : i32
    return %c0_i32, %c0_i32_0 : i32, i32
  }
  func.func @transform_3(%arg0: i32) -> (i32, i32) {
    %c0_i32 = arith.constant 0 : i32
    %c0_i32_0 = arith.constant 0 : i32
    %c0_i32_1 = arith.constant 0 : i32
    return %c0_i32, %c0_i32_0 : i32, i32
  }
  func.func @transform_4(%arg0: i32) -> (i32, i32) {
    %c0_i32 = arith.constant 0 : i32
    %c0_i32_0 = arith.constant 0 : i32
    %c0_i32_1 = arith.constant 0 : i32
    return %c0_i32, %c0_i32_0 : i32, i32
  }
  func.func @transform_5(%arg0: i32) -> (i32, i32) {
    %c0_i32 = arith.constant 0 : i32
    %c0_i32_0 = arith.constant 0 : i32
    return %c0_i32, %arg0 : i32, i32
  }
}

</mosaic_0001>

<bundles_post_ra>
// kernel: mlp_forward.2
= control target key start
LH: loop header
LB: loop body
LE: loop exit
PB: predicated region body
PF: predicated region fallthrough
CT: control target
= control target key end

     0   :  { %s504_s0 = inlined_call_operand.vmem [shape: f32[64,6], index: 0, kind: input, shape index: {}]   ;;  %s505_s1 = inlined_call_operand.vmem [shape: f32[64,1], index: 1, kind: input, shape index: {}]   ;;  %s506_s2 = inlined_call_operand.vmem [shape: f32[1,64], index: 2, kind: input, shape index: {}]   ;;  %s507_s3 = inlined_call_operand.<no memory space> [shape: f32[1,1], index: 3, kind: input, shape index: {}]   ;;  %s508_s4 = inlined_call_operand.vmem [shape: f32[6,8], index: 4, kind: input, shape index: {}]   ;;  %s509_s5 = inlined_call_operand.<no memory space> [shape: f32[], index: 5, kind: input, shape index: {}]   ;;  %s510_s6 = inlined_call_operand.vmem [shape: f32[1,128], index: 6, kind: output, shape index: {}]  }
   0x1   :  { %v11_v0 = vstv %s509_s5 }
   0x2   :  { %v24_v1 = vlaneseq  ;;  %v37_v2 = vld [vmem:[%s504_s0] sm:$0xff]  ;;  %vm94_vm0 = vcmask 48128   ;;  %v395_v6 = vmov 0   ;;  %v53_v7 = vld [vmem:[%s505_s1 + $0x38] sm:$0xff]  ;;  %v51_v8 = vld [vmem:[%s505_s1 + $0x28] sm:$0xff]  ;;  %vm119_vm3 = vcmask 1045504  }
   0x3   :  { %355 = vmatprep.mubr.msk.f32.mxu0 %vm94_vm0, %v37_v2  ;;  %v23_v3 = vld [vmem:[%s508_s4] sm:$0x3f]  ;;  %389 = vset.pattern.permute.xlu0 %v395_v6  ;;  %v52_v10 = vld [vmem:[%s505_s1 + $0x30] sm:$0xff]  ;;  %v49_v13 = vld [vmem:[%s505_s1 + $0x18] sm:$0xff]  ;;  %v396_v25 = vmov 0.0   ;;  %vm397_vm4 = vmmov 0   ;;  %v238_v59 = vstv %s507_s3 }
   0x4   :  { %v25_v4 = vshrl.u32 %v24_v1, 7  ;;  %v30_v5 = vand.u32 127, %v24_v1  ;;  %390 = vset.pattern.permute.xlu1 %v395_v6  ;;  %91 = vperm.xlu0 %389, %v53_v7   ;;  %v50_v11 = vld [vmem:[%s505_s1 + $0x20] sm:$0xff]  ;;  %v48_v14 = vld [vmem:[%s505_s1 + $0x10] sm:$0xff]  ;;  %v47_v15 = vld [vmem:[%s505_s1 + $0x8] sm:$0xff]  ;;  %vm239_vm5 = vcmask 523264  }
   0x5   :  { %81 = vperm.xlu1 %390, %v51_v8   ;;  %v38_v17 = vld [vmem:[%s504_s0 + $0x8] sm:$0xff]  ;;  %v46_v18 = vld [vmem:[%s505_s1] sm:$0xff]  ;;  %v39_v19 = vld [vmem:[%s504_s0 + $0x10] sm:$0xff]  ;;  %367 = vmatprep.subr.mxu1 %v396_v25 }
   0x6   :  { %vm27_vm1 = vcmp.lt.s32.totalorder %v25_v4, 6  ;;  %vm32_vm2 = vcmp.lt.s32.totalorder %v30_v5, 8  ;;  %v40_v20 = vld [vmem:[%s504_s0 + $0x18] sm:$0xff]  ;;  %v41_v21 = vld [vmem:[%s504_s0 + $0x20] sm:$0xff]  ;;  %v42_v22 = vld [vmem:[%s504_s0 + $0x28] sm:$0xff]  ;;  %383 = vmatprep.mubr.msk.f32.mxu1 %vm397_vm4, %v396_v25 }
   0x7   :  { %v28_v9 = vsel %vm27_vm1, %v23_v3, %v11_v0  ;;  %v43_v23 = vld [vmem:[%s504_s0 + $0x30] sm:$0xff]  ;;  %v44_v24 = vld [vmem:[%s504_s0 + $0x38] sm:$0xff]  ;;  %v236_v58 = vld [vmem:[%s506_s2] sm:$0x1] }
   0x8   :  { %v33_v12 = vsel %vm32_vm2, %v28_v9, %v11_v0  ;;  %86 = vperm.xlu0 %389, %v52_v10  }
   0x9   :  { %36 = vst [vmem:[#allocation8] sm:$0xff] %v33_v12  ;;  %76 = vperm.xlu1 %390, %v50_v11  }
   0xc   :  { %71 = vperm.xlu0 %389, %v49_v13  }
   0xd   :  { %66 = vperm.xlu1 %390, %v48_v14  }
  0x10   :  { %v45_v16 = vld [vmem:[#allocation8] sm:$0x3f]  ;;  %61 = vperm.xlu0 %389, %v47_v15  }
  0x11   :  { %353 = vmatprep.subr.msk.mxu0 %vm119_vm3, %v45_v16  ;;  %56 = vperm.xlu1 %390, %v46_v18  }
  0x12   :  { %354 = vmatpush3.msk.msra.mxu0 %vm119_vm3, %v45_v16 }
  0x13   :  { %356 = vmatmul.mubr.msk.f32.vlgmr.msra.gmra.mxu0 %vm94_vm0, %v38_v17 }
  0x14   :  { %358 = vmatprep.mubr.msk.f32.mxu0 %vm94_vm0, %v39_v19 }
  0x17   :  { %359 = vmatmul.mubr.msk.f32.gmra.mxu0 %vm94_vm0, %v40_v20 }
  0x18   :  { %361 = vmatprep.mubr.msk.f32.mxu0 %vm94_vm0, %v41_v21 }
  0x1b   :  { %362 = vmatmul.mubr.msk.f32.gmra.mxu0 %vm94_vm0, %v42_v22 }
  0x1c   :  { %364 = vmatprep.mubr.msk.f32.mxu0 %vm94_vm0, %v43_v23 }
  0x1f   :  { %365 = vmatmul.mubr.msk.f32.gmra.mxu0 %vm94_vm0, %v44_v24 }
  0x7f   :  { %v92_v27 = vpop.permute.xlu0 %91 }
  0x80   :  { %v82_v29 = vpop.permute.xlu1 %81 }
  0x83   :  { %v87_v32 = vpop.permute.xlu0 %86 }
  0x84   :  { %v77_v34 = vpop.permute.xlu1 %76 }
  0x87   :  { %v72_v38 = vpop.permute.xlu0 %71 }
  0x88   :  { %v67_v43 = vpop.permute.xlu1 %66 }
  0x8b   :  { %v62_v48 = vpop.permute.xlu0 %61 }
  0x8c   :  { %v57_v51 = vpop.permute.xlu1 %56 }
  0xd3   :  { %v357_v26 = vpop.f32.mrf.mxu0 }
  0xd4   :  { %v195_v52 = vadd.f32 %v357_v26, %v62_v48 }
  0xd5   :  { %v189_v28 = vpop.f32.mrf.mxu0 }
  0xd6   :  { %v190_v54 = vadd.f32 %v189_v28, %v57_v51  ;;  %v229_v56 = vmax.f32 %v195_v52, 0.0 }
  0xd7   :  { %v360_v30 = vpop.f32.mrf.mxu0 }
  0xd8   :  { %v205_v46 = vadd.f32 %v360_v30, %v72_v38  ;;  %v228_v57 = vmax.f32 %v190_v54, 0.0 }
  0xd9   :  { %v199_v31 = vpop.f32.mrf.mxu0 }
  0xda   :  { %v200_v49 = vadd.f32 %v199_v31, %v67_v43  ;;  %v231_v53 = vmax.f32 %v205_v46, 0.0 }
  0xdb   :  { %v363_v33 = vpop.f32.mrf.mxu0 }
  0xdc   :  { %v215_v40 = vadd.f32 %v363_v33, %v82_v29  ;;  %v230_v55 = vmax.f32 %v200_v49, 0.0 }
  0xdd   :  { %v209_v35 = vpop.f32.mrf.mxu0 }
  0xde   :  { %v210_v44 = vadd.f32 %v209_v35, %v77_v34  ;;  %v233_v47 = vmax.f32 %v215_v40, 0.0 }
  0xdf   :  { %v366_v36 = vpop.f32.mrf.mxu0 }
  0xe0   :  { %v225_v37 = vadd.f32 %v366_v36, %v92_v27  ;;  %v232_v50 = vmax.f32 %v210_v44, 0.0 }
  0xe1   :  { %v219_v39 = vpop.f32.mrf.mxu0 }
  0xe2   :  { %v235_v41 = vmax.f32 %v225_v37, 0.0  ;;  %v220_v42 = vadd.f32 %v219_v39, %v87_v32 }
  0xe4   :  { %v234_v45 = vmax.f32 %v220_v42, 0.0  ;;  %368 = vmatpush3.msra.mxu1 %v235_v41 }
  0xe5   :  { %369 = vmatprep.subr.mxu1 %v396_v25 }
  0xe6   :  { %370 = vmatpush3.msra.mxu1 %v234_v45 }
  0xe7   :  { %371 = vmatprep.subr.mxu1 %v396_v25 }
  0xe8   :  { %372 = vmatpush3.msra.mxu1 %v233_v47 }
  0xe9   :  { %373 = vmatprep.subr.mxu1 %v396_v25 }
  0xea   :  { %374 = vmatpush3.msra.mxu1 %v232_v50 }
  0xeb   :  { %375 = vmatprep.subr.mxu1 %v396_v25 }
  0xec   :  { %376 = vmatpush3.msra.mxu1 %v231_v53 }
  0xed   :  { %377 = vmatprep.subr.mxu1 %v396_v25 }
  0xee   :  { %378 = vmatpush3.msra.mxu1 %v230_v55 }
  0xef   :  { %379 = vmatprep.subr.mxu1 %v396_v25 }
  0xf0   :  { %380 = vmatpush3.msra.mxu1 %v229_v56 }
  0xf1   :  { %381 = vmatprep.subr.mxu1 %v396_v25 }
  0xf2   :  { %382 = vmatpush3.msra.mxu1 %v228_v57 }
  0xf3   :  { %384 = vmatmul.mubr.msk.f32.vlgmr.msra.gmra.mxu1 %vm239_vm5, %v236_v58 }
 0x1b3   :  { %v309_v60 = vpop.f32.mrf.mxu1 }
 0x1b4   :  { %v310_v61 = vadd.f32 %v309_v60, %v238_v59 }
 0x1b5   :  { %v385_v62 = vpop.f32.mrf.mxu1 }
 0x1b6   :  { %v334_v63 = vmul.f32 -1.442695, %v310_v61 }
 0x1b8   :  { %391 = vpow2.f32 %v334_v63 }
 0x1c5   :  { %v392_v0 = vpop.eup %391 }
 0x1c6   :  { %v316_v1 = vadd.f32 1.0, %v392_v0 }
 0x1c8   :  { %393 = vrcp.f32 %v316_v1 }
 0x1d5   :  { %v394_v2 = vpop.eup %393 }
 0x1d6   :  { %319 = vst [vmem:[%s510_s6] sm:$0x1] %v394_v2 }

</bundles_post_ra>
